<compile_context>
chip_gen: v5e
topology: v5e:2x2
jax: 0.10.0
libtpu: 0.0.40
codegen_flags: <defaults>
</compile_context>

<pallas_src>
import jax
import jax.numpy as jnp
from jax.experimental import pallas as pl
from jax.experimental.pallas import tpu as pltpu

_LANE = 128
_TARGET_BLOCK_BYTES = 6 << 20    # ~6 MiB per buffer (per review, v6e/v7x sweet spot)
_VMEM_LIMIT_BYTES = 40 << 20     # 2 arrays x 2 pipeline buffers x 6 MiB ~= 24 MiB
                                 # + headroom; < 64 MiB (v7x) and < 128 MiB (v5e/v6e).


def _mish_kernel(x_ref, o_ref):
    # tanh(softplus(x)) == (e^{2x} + 2e^x) / (e^{2x} + 2e^x + 2).
    # Branchless, overflow-free form using m = exp(-|x|):
    #   x > 0 : (1 + 2m)   / (1 + 2m + 2m^2)
    #   x <= 0: (m^2 + 2m) / (m^2 + 2m + 2)
    x = x_ref[...].astype(jnp.float32)
    m = jnp.exp(-jnp.abs(x))
    pos = x > 0.0
    two_m = 2.0 * m
    m2 = m * m
    num = jnp.where(pos, 1.0 + two_m, m2 + two_m)
    den = num + jnp.where(pos, 2.0 * m2, 2.0)          # den in (1, 5], never 0
    r = pl.reciprocal(den, approx=True)                 # EUP vrcp (separate slot)
    r = r * (2.0 - den * r)                             # Newton step 1 (VPU)
    r = r * (2.0 - den * r)                             # Newton step 2 -> ~f32 exact
    o_ref[...] = (x * num * r).astype(o_ref.dtype)


def _choose_tile_rows(rows: int, itemsize: int) -> int:
    """Block row-count: ~6 MiB per buffer, multiple of the packed sublane factor
    (8 f32 / 16 bf16 / 32 int8), capped so the grid has >= 2 steps whenever a
    split is legal (lets v7x shard across its 2 TensorCores)."""
    pack = 32 // itemsize
    tr = (_TARGET_BLOCK_BYTES // (_LANE * itemsize)) // pack * pack
    tr = max(pack, tr)
    if rows <= pack:
        return rows                      # full-extent block (always legal)
    half = pl.cdiv(pl.cdiv(rows, 2), pack) * pack
    return min(tr, half)


def mish(x: jax.Array) -> jax.Array:
    """Elementwise Mish: x * tanh(softplus(x)). Matches torch semantics."""
    orig_shape = x.shape
    dtype = x.dtype
    n = x.size
    if n == 0:
        return x

    itemsize = jnp.dtype(dtype).itemsize
    x_flat = jnp.ravel(x)

    compiler_params = pltpu.CompilerParams(
        dimension_semantics=("parallel",),
        vmem_limit_bytes=_VMEM_LIMIT_BYTES,
    )
    cost = pl.CostEstimate(
        flops=12 * n,
        transcendentals=2 * n,
        bytes_accessed=2 * n * itemsize,
    )

    if n % _LANE == 0:
        # Lane-dense (rows, 128) slab; free reshape of a contiguous buffer.
        rows = n // _LANE
        x2d = x_flat.reshape(rows, _LANE)
        tile_rows = _choose_tile_rows(rows, itemsize)
        grid = (pl.cdiv(rows, tile_rows),)   # partial last block masked by Pallas

        out2d = pl.pallas_call(
            _mish_kernel,
            out_shape=jax.ShapeDtypeStruct((rows, _LANE), dtype),
            grid_spec=pltpu.PrefetchScalarGridSpec(
                num_scalar_prefetch=0,
                grid=grid,
                in_specs=[pl.BlockSpec((tile_rows, _LANE), lambda i: (i, 0))],
                out_specs=pl.BlockSpec((tile_rows, _LANE), lambda i: (i, 0)),
            ),
            compiler_params=compiler_params,
            cost_estimate=cost,
        )(x2d)
        return out2d.reshape(orig_shape)

    # Ragged path (numel % 128 != 0): flat 1D view, block size a multiple of 128
    # (or the full array when n < 128); Pallas masks the partial trailing block.
    # No jnp.pad / output-slice HBM round-trips.
    if n < _LANE:
        block = n
    else:
        target = max(_LANE, ((1 << 20) // itemsize // _LANE) * _LANE)
        block = min(target, pl.cdiv(n, _LANE) * _LANE)
        half = pl.cdiv(pl.cdiv(n, 2), _LANE) * _LANE
        block = max(_LANE, min(block, half))   # >= 2 grid steps when possible
    grid = (pl.cdiv(n, block),)

    out_flat = pl.pallas_call(
        _mish_kernel,
        out_shape=jax.ShapeDtypeStruct((n,), dtype),
        grid_spec=pltpu.PrefetchScalarGridSpec(
            num_scalar_prefetch=0,
            grid=grid,
            in_specs=[pl.BlockSpec((block,), lambda i: (i,))],
            out_specs=pl.BlockSpec((block,), lambda i: (i,)),
        ),
        compiler_params=compiler_params,
        cost_estimate=cost,
    )(x_flat)
    return out_flat.reshape(orig_shape)


def mish_ref(x: jax.Array) -> jax.Array:
    """Pure-JAX reference: x * tanh(softplus(x)) with stable softplus."""
    xf = x.astype(jnp.float32)
    sp = jnp.maximum(xf, 0.0) + jnp.log1p(jnp.exp(-jnp.abs(xf)))
    return (xf * jnp.tanh(sp)).astype(x.dtype)


if __name__ == "__main__":
    key = jax.random.PRNGKey(0)

    # Small NCHW feature map, consistent with the PyTorch module's usage.
    x = jax.random.normal(key, (2, 4, 16, 16), dtype=jnp.float32) * 3.0
    y = jax.block_until_ready(mish(x))
    y_ref = mish_ref(x)
    assert y.shape == x.shape and y.dtype == x.dtype
    assert jnp.allclose(y, y_ref, atol=1e-5, rtol=1e-5)

    # Exercise the ragged (numel % 128 != 0) path once (no pad / slice copies).
    x_odd = jax.random.normal(jax.random.PRNGKey(1), (3, 5, 7), dtype=jnp.float32) * 3.0
    y_odd = jax.block_until_ready(mish(x_odd))
    assert y_odd.shape == x_odd.shape and y_odd.dtype == x_odd.dtype
    assert jnp.allclose(y_odd, mish_ref(x_odd), atol=1e-5, rtol=1e-5)

    print("KERNEL_OK")
</pallas_src>

<mosaic_0001>
module attributes {stable_mosaic.version = 11 : i64} {
  func.func @_mish_kernel(%arg0: i32, %arg1: memref<8x128xf32, #tpu.memory_space<vmem>>, %arg2: memref<8x128xf32, #tpu.memory_space<vmem>>) attributes {dimension_semantics = [#tpu.dimension_semantics<parallel>], iteration_bounds = array<i64: 2>, scalar_prefetch = 0 : i64, scratch_operands = 0 : i64, tpu.core_type = #tpu.core_type<tc>, window_params = [{transform_indices = @transform_0, window_bounds = array<i64: 8, 128>}, {transform_indices = @transform_1, window_bounds = array<i64: 8, 128>}]} {
    %c0 = arith.constant 0 : index
    %c0_0 = arith.constant 0 : index
    %0 = vector.load %arg1[%c0, %c0_0] : memref<8x128xf32, #tpu.memory_space<vmem>>, vector<8x128xf32>
    %1 = math.absf %0 : vector<8x128xf32>
    %cst = arith.constant 0.000000e+00 : f32
    %2 = vector.broadcast %cst : f32 to vector<8x128xf32>
    %3 = arith.subf %2, %1 : vector<8x128xf32>
    %4 = math.exp %3 : vector<8x128xf32>
    %cst_1 = arith.constant 0.000000e+00 : f32
    %5 = vector.broadcast %cst_1 : f32 to vector<8x128xf32>
    %6 = arith.cmpf ogt, %0, %5 : vector<8x128xf32>
    %cst_2 = arith.constant 2.000000e+00 : f32
    %7 = vector.broadcast %cst_2 : f32 to vector<8x128xf32>
    %8 = arith.mulf %7, %4 : vector<8x128xf32>
    %9 = arith.mulf %4, %4 : vector<8x128xf32>
    %cst_3 = arith.constant 1.000000e+00 : f32
    %10 = vector.broadcast %cst_3 : f32 to vector<8x128xf32>
    %11 = arith.addf %10, %8 : vector<8x128xf32>
    %12 = arith.addf %9, %8 : vector<8x128xf32>
    %13 = arith.select %6, %11, %12 : vector<8x128xi1>, vector<8x128xf32>
    %cst_4 = arith.constant 2.000000e+00 : f32
    %14 = vector.broadcast %cst_4 : f32 to vector<8x128xf32>
    %15 = arith.mulf %14, %9 : vector<8x128xf32>
    %cst_5 = arith.constant 2.000000e+00 : f32
    %16 = vector.broadcast %cst_5 : f32 to vector<8x128xf32>
    %17 = arith.select %6, %15, %16 : vector<8x128xi1>, vector<8x128xf32>
    %18 = arith.addf %13, %17 : vector<8x128xf32>
    %19 = tpu.reciprocal %18 {approx = true} : vector<8x128xf32> -> vector<8x128xf32>
    %20 = arith.mulf %18, %19 : vector<8x128xf32>
    %cst_6 = arith.constant 2.000000e+00 : f32
    %21 = vector.broadcast %cst_6 : f32 to vector<8x128xf32>
    %22 = arith.subf %21, %20 : vector<8x128xf32>
    %23 = arith.mulf %19, %22 : vector<8x128xf32>
    %24 = arith.mulf %18, %23 : vector<8x128xf32>
    %cst_7 = arith.constant 2.000000e+00 : f32
    %25 = vector.broadcast %cst_7 : f32 to vector<8x128xf32>
    %26 = arith.subf %25, %24 : vector<8x128xf32>
    %27 = arith.mulf %23, %26 : vector<8x128xf32>
    %28 = arith.mulf %0, %13 : vector<8x128xf32>
    %29 = arith.mulf %28, %27 : vector<8x128xf32>
    %c0_8 = arith.constant 0 : index
    %c0_9 = arith.constant 0 : index
    %30 = vector.load %arg2[%c0_8, %c0_9] : memref<8x128xf32, #tpu.memory_space<vmem>>, vector<8x128xf32>
    tpu.vector_store %arg2[%c0_8, %c0_9], %29 {strides = array<i32>} : memref<8x128xf32, #tpu.memory_space<vmem>>, vector<8x128xf32>,
    return
  }
  func.func @transform_0(%arg0: i32) -> (i32, i32) {
    %c0_i32 = arith.constant 0 : i32
    %c0_i32_0 = arith.constant 0 : i32
    return %arg0, %c0_i32 : i32, i32
  }
  func.func @transform_1(%arg0: i32) -> (i32, i32) {
    %c0_i32 = arith.constant 0 : i32
    %c0_i32_0 = arith.constant 0 : i32
    return %arg0, %c0_i32 : i32, i32
  }
}

</mosaic_0001>

<bundles_post_ra>
// kernel: tpu_custom_call.1
= control target key start
LH: loop header
LB: loop body
LE: loop exit
PB: predicated region body
PF: predicated region fallthrough
CT: control target
= control target key end

     0   :  { %6 = vsyncpa [#allocation3], 0  ;;  %s541_s0 = inlined_call_operand.hbm [shape: f32[16,128], index: 0, kind: input, shape index: {}]   ;;  %s542_s1 = inlined_call_operand.hbm [shape: f32[16,128], index: 1, kind: output, shape index: {}]  }
   0x1   :  { %8 = vsyncpa [#allocation3 + $0x1], 0 }
   0x2   :  { %9 = vsyncpa [#allocation4], 0 }
   0x3   :  { %11 = vsyncpa [#allocation4 + $0x1], 0  ;;  %s414_s6 = smov 0   ;;  %s416_s7 = smov 0  }
   0x4   :  { %s418_s8 = smov 0   ;;  %s420_s9 = smov 0  }
   0x5 LB: > { %s435_s10 = sadd.s32 4294967295, %s402_s9   ;;  %s244_s11 = sadd.s32 4294967294, %s402_s9   ;;  %s402_s9 = sphi %s420_s9, %s552_s9   ;;  %s398_s8 = sphi %s418_s8, %s551_s8   ;;  %s394_s7 = sphi %s416_s7, %s550_s7   ;;  %s390_s6 = sphi %s414_s6, %s549_s6  }
   0x6   : > { %s439_s12 = sadd.s32 1, %s402_s9   ;;  %s24_s13 = sadd.s32 1, %s398_s8 }
   0x7   : > { %s21_s14 = ssub.s32 %s402_s9, %s439_s12  ;;  %p31_p0 = scmp.ne.s32.totalorder %s398_s8, %s394_s7 }
   0x8   : > { %p22_p1 = scmp.eq.s32.totalorder %s21_s14, 0  ;;  %p32_p2 = scmp.eq.s32.totalorder %s402_s9, 0 }
   0x9   : > { %p37_p3 = scmp.ne.s32.totalorder %s394_s7, %s390_s6  ;;  %p38_p4 = scmp.eq.s32.totalorder %s435_s10, 0 }
   0xa   : > { %s451_s15 = scalar_select %p22_p1, %s398_s8, %s24_s13  }
   0xb   : > { %p453_p5 = por %p32_p2, %p31_p0  ;;  %p457_p6 = por %p38_p4, %p37_p3 }
   0xc   : > { %p61_p7 = scmp.eq.s32.totalorder %s435_s10, 1  ;;  %p67_p8 = scmp.eq.s32.totalorder %s244_s11, 1 }
   0xd   : > { %p268_p10 = scmp.lt.s32.totalorder %s402_s9, 2  ;;  %s87_s20 = sand.u32 1, %s398_s8  }
   0xe   : > { %p464_p11 = por %p61_p7, %p31_p0  ;;  %p468_p12 = por %p67_p8, %p37_p3 }
   0xf   : > { %s248_s21 = sshll.u32 %s402_s9, 3  ;;  %s247_s22 = sshll.u32 %s87_s20, 3 }
  0x10   : > { %s95_s25 = scalar_lea.hbm %s541_s0, %s248_s21  ;;  %s91_s27 = scalar_lea.vmem [#allocation2], %s247_s22 }
  0x11   : > { %s97_s26 = sshll.u32 %s95_s25, 4  ;;  %s99_s28 = sshll.u32 %s91_s27, 4  ;;  %s98_s26 = int_to_ptr.hbm [resolvable:$true] %s97_s26  ;;  %s100_s28 = int_to_ptr.vmem [resolvable:$true] %s99_s28 }
  0x12   : > { %p479_p13 = pnand %p268_p10, %p453_p5  ;;  %p249_p0 = scmp.ge.s32.totalorder %s402_s9, 1 }
  0x13   : > { %p104_p1 = scmp.lt.s32.totalorder %s402_s9, 3  ;;  %s88_s30 = scalar_lea.sflag [#allocation3], %s87_s20 }
  0x14   : > { %s306_s2 = sshra.s32 %s98_s26, 4  ;;  %p310_p3 = pneg %p479_p13  ;;  %s307_s2 = int_to_ptr.hbm [resolvable:$true] %s306_s2 }
  0x15   : > { %s308_s3 = scalar_lea.hbm %s307_s2, 8  ;;  %s313_s11 = scalar_lea.hbm %s541_s0, 16 }
  0x16   : > { %p309_p2 = scmp.ne.s32.totalorder %s307_s2, %s308_s3  ;;  %p314_p5 = scmp.lt.s32.totalorder %s307_s2, %s541_s0 }
  0x17   : > { %p315_p8 = scmp.lt.s32.totalorder %s313_s11, %s308_s3 }
  0x18   : > { %p311_p4 = pnand %p310_p3, %p309_p2 }
  0x19   : > { %p316_p10 = por %p315_p8, %p314_p5 }
  0x1a   : > { %p312_p7 = pneg %p311_p4 }
  0x1c   : > { %p317_p9 = pnand %p316_p10, %p312_p7 }
  0x1e   : > { %320 = shalt.err (!%p317_p9)
}
  0x1f   : > { %263 = dma.hbm_to_vmem [thread:$0]  (!%p479_p13), %s98_s26, 128, %s100_s28, %s88_s30  }
  0x20   : > { %p105_p2 = pnand %p249_p0, %p104_p1 }
  0x21   : > { %s500_s16 = sand.u32 (!%p105_p2), 1, %s394_s7  }
  0x22   : > { %108 = sbr.rel (%p105_p2) target bundleno = 85 (0x55), region = 24  ;;  %s250_s20 = sshll.u32 (!%p105_p2), %s500_s16, 3 }
  0x23   : > { %s111_s21 = scalar_lea.sflag (!%p105_p2), [#allocation3], %s500_s16  ;;  %s114_s22 = scalar_lea.vmem (!%p105_p2), [#allocation2], %s250_s20 }
  0x27   : > { %381 = dma.done.wait (%p457_p6), %s111_s21, 128  }
  0x28   : > { %383 = vsyncadd (%p457_p6), %s111_s21, 4294967168  ;;  %v134_v0 = vld [vmem:[%s114_s22] sm:$0xff]  ;;  %s253_s17 = sshll.u32 %s435_s10, 3  ;;  %s133_s26 = scalar_lea.vmem [#allocation5], %s250_s20 }
  0x29   : > { %v135_v1 = vand.u32 2147483647, %v134_v0  ;;  %vm139_vm0 = vcmp.gt.f32.partialorder %v134_v0, 0.0  ;;  %s169_s25 = scalar_lea.hbm %s542_s1, %s253_s17  ;;  %s171_s27 = sshll.u32 %s133_s26, 4  ;;  %s172_s27 = int_to_ptr.vmem [resolvable:$true] %s171_s27 }
  0x2a   : > { %s173_s28 = sshll.u32 %s169_s25, 4  ;;  %s159_s29 = scalar_lea.sflag [#allocation4], %s500_s16  ;;  %s174_s28 = int_to_ptr.hbm [resolvable:$true] %s173_s28 }
  0x2b   : > { %v136_v2 = vsub.f32 0.0, %v135_v1  ;;  %s350_s30 = sshra.s32 %s174_s28, 4  ;;  %s356_s4 = scalar_lea.hbm %s542_s1, 16  ;;  %s351_s30 = int_to_ptr.hbm [resolvable:$true] %s350_s30 }
  0x2c   : > { %s352_s10 = scalar_lea.hbm %s351_s30, 8  ;;  %p357_p0 = scmp.lt.s32.totalorder %s351_s30, %s542_s1 }
  0x2d   : > { %v137_v3 = vmul.f32 1.442695, %v136_v2  ;;  %p353_p6 = scmp.ne.s32.totalorder %s351_s30, %s352_s10  ;;  %p358_p1 = scmp.lt.s32.totalorder %s356_s4, %s352_s10 }
  0x2f   : > { %302 = vpow2.f32 %v137_v3  ;;  %p354_p9 = pnand %p353_p6, %p464_p11  ;;  %p359_p3 = por %p358_p1, %p357_p0 }
  0x31   : > { %p355_p13 = pneg %p354_p9 }
  0x33   : > { %p360_p4 = pnand %p359_p3, %p355_p13 }
  0x35   : > { %v303_v4 = vpop.eup %302 }
  0x36   : > { %v140_v5 = vmul.f32 2.0, %v303_v4  ;;  %v141_v6 = vmul.f32 %v303_v4, %v303_v4 }
  0x38   : > { %v142_v7 = vadd.f32 1.0, %v140_v5  ;;  %v143_v8 = vadd.f32 %v141_v6, %v140_v5  ;;  %v145_v9 = vmul.f32 2.0, %v141_v6 }
  0x3a   : > { %v144_v10 = vsel %vm139_vm0, %v142_v7, %v143_v8  ;;  %v146_v11 = vsel %vm139_vm0, %v145_v9, 2.0 }
  0x3b   : > { %v147_v12 = vadd.f32 %v146_v11, %v144_v10  ;;  %v155_v19 = vmul.f32 %v144_v10, %v134_v0 }
  0x3d   : > { %304 = vrcp.f32 %v147_v12 }
  0x43   : > { %v305_v13 = vpop.eup %304 }
  0x44   : > { %v149_v14 = vmul.f32 %v305_v13, %v147_v12 }
  0x46   : > { %v150_v15 = vsub.f32 2.0, %v149_v14 }
  0x48   : > { %v151_v16 = vmul.f32 %v305_v13, %v150_v15 }
  0x4a   : > { %v152_v17 = vmul.f32 %v151_v16, %v147_v12 }
  0x4c   : > { %v153_v18 = vsub.f32 2.0, %v152_v17 }
  0x4e   : > { %v154_v20 = vmul.f32 %v153_v18, %v151_v16 }
  0x50   : > { %v156_v21 = vmul.f32 %v155_v19, %v154_v20 }
  0x52   : > { %157 = vst [vmem:[%s133_s26] sm:$0xff] %v156_v21 }
  0x53   : > { %363 = shalt.err (!%p360_p4)
}
  0x54   : > { %258 = dma.vmem_to_hbm [thread:$0]  (%p464_p11), %s172_s27, 128, %s174_s28, %s159_s29  }
  0x55 PF: > { %s185_s13 = sand.u32 1, %s390_s6   ;;  %p548_p7 = scmp.ge.s32.totalorder %s402_s9, 2 }
  0x56   : > { %s186_s14 = scalar_lea.sflag [#allocation4], %s185_s13 }
  0x57   : > { %p265_p5 = pnand %p548_p7, %p468_p12 }
  0x59   : > { %p266_p8 = pneg %p265_p5 }
  0x5b   : > { %385 = dma.done.wait (%p266_p8), %s186_s14, 128  }
  0x5c   : > { %387 = vsyncadd (%p266_p8), %s186_s14, 4294967168  ;;  %p14_p10 = scmp.ge.s32.totalorder %s439_s12, 4   ;;  %s549_s6 = smov %s394_s7 }
  0x5d   : > { %s550_s7 = smov %s398_s8  ;;  %s551_s8 = smov %s451_s15 }
  0x5e   : > { %s552_s9 = smov %s439_s12  ;;  %16 = sbr.rel (!%p14_p10) target bundleno = 5 (0x5), region = 69 }
  0x63   :  { %192 = vsyncpa [#allocation3], 1 }
  0x64   :  { %194 = vsyncpa [#allocation3 + $0x1], 1 }
  0x65   :  { %195 = vsyncpa [#allocation4], 1 }
  0x66   :  { %197 = vsyncpa [#allocation4 + $0x1], 1 }

</bundles_post_ra>
